<compile_context>
chip_gen: v5e
topology: v5e:2x2
jax: 0.10.0
libtpu: 0.0.40
codegen_flags: <defaults>
</compile_context>

<pallas_src>
import functools

import jax
import jax.numpy as jnp
import numpy as np
from jax.experimental import pallas as pl
from jax.experimental.pallas import tpu as pltpu


_LANE = 128      # TPU lane width: every feature dim padded to a multiple of this
_SUBLANE = 8     # f32 sublane height: batch padded to a multiple of this


def _round_up(x, m):
    return (x + m - 1) // m * m


# ----------------------------------------------------------------------------
# Pallas kernel: the entire fused MLP (Linear -> ReLU -> ... -> Linear).
# ----------------------------------------------------------------------------
def _fused_mlp_kernel(*refs, n_layers):
    """refs = (x, w0, b0, w1, b1, ..., w_{L-1}, b_{L-1}, out).

    Activations stay on-chip for the whole stack; only the bf16 input, the
    bf16 weights, the f32 biases and the final f32 logits ever cross HBM.
    """
    x_ref = refs[0]
    o_ref = refs[-1]
    wb = refs[1:-1]

    h = x_ref[...]                               # bf16 input activations
    for i in range(n_layers):
        w_ref = wb[2 * i]                        # (Din_p, Dout_p) bf16
        b_ref = wb[2 * i + 1]                    # (1, Dout_p)     f32
        # bf16 MXU operands, f32 accumulation; epilogue in f32.  Layer 0's
        # input is already bf16 from the wrapper, so no cast is needed there.
        h_mxu = h if h.dtype == jnp.bfloat16 else h.astype(jnp.bfloat16)
        h = jnp.dot(h_mxu, w_ref[...], preferred_element_type=jnp.float32)
        h = h + b_ref[...]
        if i < n_layers - 1:                     # last ReLU was popped in torch
            h = jnp.maximum(h, 0.0)
    o_ref[...] = h.astype(o_ref.dtype)


# ----------------------------------------------------------------------------
# One-time parameter packing (padding + bf16 cast).  NOT on the per-call path.
# ----------------------------------------------------------------------------
def prepare_params(params):
    """Zero-pad every feature dim to a multiple of 128, cast weights to bf16,
    reshape biases to (1, Dout_p).  Returns (flat_wb, dims, dims_p)."""
    dims = tuple([params[0][0].shape[0]] + [w.shape[1] for (w, _) in params])
    dims_p = tuple(_round_up(d, _LANE) for d in dims)

    flat_wb = []
    for i, (w, b) in enumerate(params):
        din, dout = w.shape
        dinp, doutp = dims_p[i], dims_p[i + 1]
        w_p = jnp.zeros((dinp, doutp), jnp.bfloat16).at[:din, :dout].set(
            w.astype(jnp.bfloat16))
        b_p = jnp.zeros((1, doutp), jnp.float32).at[:, :dout].set(
            b.reshape(1, dout))
        flat_wb += [w_p, b_p]
    return tuple(flat_wb), dims, dims_p


# ----------------------------------------------------------------------------
# Per-forward path: jitted, single pallas_call.
# ----------------------------------------------------------------------------
@functools.partial(jax.jit, static_argnames=("dims", "dims_p"))
def _forward_impl(x, flat_wb, dims, dims_p):
    # nn.Flatten(): (B, C, H, W) -> (B, C*H*W), row-major.
    x = x.reshape(x.shape[0], -1)
    B = x.shape[0]
    n_layers = len(dims) - 1

    # Pad batch to the f32 sublane height and features to the lane width, and
    # hand the input to the kernel as bf16 (halves input DMA bytes).  Zero
    # padding is exact: padded rows/cols contribute 0 through matmul, bias-pad
    # and ReLU; padded batch rows only pick up bias and are sliced away below.
    Bp = _round_up(max(B, 1), _SUBLANE)
    x_p = jnp.zeros((Bp, dims_p[0]), jnp.bfloat16).at[:B, :dims[0]].set(
        x.astype(jnp.bfloat16))

    kernel = functools.partial(_fused_mlp_kernel, n_layers=n_layers)

    # Single grid step covering the whole (tiny) model.  The default
    # double-buffering of these blocks costs ~1.3 MiB total, well inside the
    # 8 MiB budget, so the default pipeline mode is accepted knowingly.
    in_specs = [pl.BlockSpec((Bp, dims_p[0]), lambda _: (0, 0))]
    for i in range(n_layers):
        dinp, doutp = dims_p[i], dims_p[i + 1]
        in_specs.append(pl.BlockSpec((dinp, doutp), lambda _: (0, 0)))
        in_specs.append(pl.BlockSpec((1, doutp), lambda _: (0, 0)))

    out_p = pl.pallas_call(
        kernel,
        out_shape=jax.ShapeDtypeStruct((Bp, dims_p[-1]), jnp.float32),
        grid=(1,),
        in_specs=in_specs,
        out_specs=pl.BlockSpec((Bp, dims_p[-1]), lambda _: (0, 0)),
        compiler_params=pltpu.CompilerParams(
            # Tight, portable budget: ~1.5 MiB actually needed; 8 MiB leaves
            # headroom while staying far below v7x's 64 MiB/TC physical VMEM.
            vmem_limit_bytes=8 * 1024 * 1024,
        ),
    )(x_p, *flat_wb)

    return out_p[:B, :dims[-1]]


def neural_network_forward(x, packed):
    """Equivalent of NeuralNetwork.forward: flatten, then fused Linear/ReLU stack."""
    flat_wb, dims, dims_p = packed
    return _forward_impl(x, flat_wb, dims, dims_p)


# ----------------------------------------------------------------------------
# Model: deterministic parameter init + pure-JAX reference.
# ----------------------------------------------------------------------------
def init_params(key, network_parameters):
    """Deterministic init mimicking torch.nn.Linear's U(-1/sqrt(fan_in), ...)."""
    params = []
    for i in range(len(network_parameters) - 1):
        fan_in = network_parameters[i]
        fan_out = network_parameters[i + 1]
        key, kw, kb = jax.random.split(key, 3)
        bound = 1.0 / np.sqrt(fan_in)
        # Stored as (in_features, out_features) so the kernel computes x @ W.
        w = jax.random.uniform(kw, (fan_in, fan_out), jnp.float32, -bound, bound)
        b = jax.random.uniform(kb, (fan_out,), jnp.float32, -bound, bound)
        params.append((w, b))
    return params


def reference_forward(x, params):
    """Pure-JAX reference using the same bf16-operand / f32-accum math."""
    x = x.reshape(x.shape[0], -1)
    n_layers = len(params)
    for i, (w, b) in enumerate(params):
        x = jnp.dot(x.astype(jnp.bfloat16), w.astype(jnp.bfloat16),
                    preferred_element_type=jnp.float32) + b
        if i < n_layers - 1:
            x = jnp.maximum(x, 0.0)
    return x


if __name__ == "__main__":
    key = jax.random.PRNGKey(0)
    k_in, k_params = jax.random.split(key)

    # Small NCHW input consistent with flatten -> MLP usage.
    B, C, H, W = 2, 4, 16, 16
    x = jax.random.normal(k_in, (B, C, H, W), jnp.float32)

    # network_parameters: [flattened_input, hidden..., output]
    network_parameters = [C * H * W, 256, 128, 10]
    params = init_params(k_params, network_parameters)

    # One-time packing (padding + bf16 cast) — off the per-forward path.
    packed = prepare_params(params)

    logits = jax.block_until_ready(neural_network_forward(x, packed))
    ref = jax.block_until_ready(reference_forward(x, params))

    assert logits.shape == (B, network_parameters[-1]), logits.shape
    np.testing.assert_allclose(np.asarray(logits), np.asarray(ref),
                               rtol=1e-4, atol=1e-4)

    print("KERNEL_OK")
</pallas_src>

<mosaic_0001>
module attributes {stable_mosaic.version = 11 : i64} {
  func.func @_fused_mlp_kernel(%arg0: i32, %arg1: memref<8x1024xbf16, #tpu.memory_space<vmem>>, %arg2: memref<1024x256xbf16, #tpu.memory_space<vmem>>, %arg3: memref<1x256xf32, #tpu.memory_space<vmem>>, %arg4: memref<256x128xbf16, #tpu.memory_space<vmem>>, %arg5: memref<1x128xf32, #tpu.memory_space<vmem>>, %arg6: memref<128x128xbf16, #tpu.memory_space<vmem>>, %arg7: memref<1x128xf32, #tpu.memory_space<vmem>>, %arg8: memref<8x128xf32, #tpu.memory_space<vmem>>) attributes {dimension_semantics = [#tpu.dimension_semantics<arbitrary>], iteration_bounds = array<i64: 1>, scalar_prefetch = 0 : i64, scratch_operands = 0 : i64, tpu.core_type = #tpu.core_type<tc>, window_params = [{pipeline_mode = #tpu.pipeline_mode<synchronous>, transform_indices = @transform_0, window_bounds = array<i64: 8, 1024>}, {pipeline_mode = #tpu.pipeline_mode<synchronous>, transform_indices = @transform_1, window_bounds = array<i64: 1024, 256>}, {pipeline_mode = #tpu.pipeline_mode<synchronous>, transform_indices = @transform_2, window_bounds = array<i64: 1, 256>}, {pipeline_mode = #tpu.pipeline_mode<synchronous>, transform_indices = @transform_3, window_bounds = array<i64: 256, 128>}, {pipeline_mode = #tpu.pipeline_mode<synchronous>, transform_indices = @transform_4, window_bounds = array<i64: 1, 128>}, {pipeline_mode = #tpu.pipeline_mode<synchronous>, transform_indices = @transform_5, window_bounds = array<i64: 128, 128>}, {pipeline_mode = #tpu.pipeline_mode<synchronous>, transform_indices = @transform_6, window_bounds = array<i64: 1, 128>}, {pipeline_mode = #tpu.pipeline_mode<synchronous>, transform_indices = @transform_7, window_bounds = array<i64: 8, 128>}]} {
    %c0 = arith.constant 0 : index
    %c0_0 = arith.constant 0 : index
    %0 = vector.load %arg1[%c0, %c0_0] : memref<8x1024xbf16, #tpu.memory_space<vmem>>, vector<8x1024xbf16>
    %c0_1 = arith.constant 0 : index
    %c0_2 = arith.constant 0 : index
    %1 = vector.load %arg2[%c0_1, %c0_2] : memref<1024x256xbf16, #tpu.memory_space<vmem>>, vector<1024x256xbf16>
    %cst = arith.constant dense<0.000000e+00> : vector<8x256xf32>
    %2 = tpu.matmul %0, %1, %cst {dimension_numbers = #tpu.dot_dimension_numbers<[1], [0], [0], [1], [0, 0, 1, 1], [], []>} : vector<8x1024xbf16>, vector<1024x256xbf16>, vector<8x256xf32> -> vector<8x256xf32>
    %c0_3 = arith.constant 0 : index
    %c0_4 = arith.constant 0 : index
    %3 = vector.load %arg3[%c0_3, %c0_4] : memref<1x256xf32, #tpu.memory_space<vmem>>, vector<1x256xf32>
    %4 = vector.broadcast %3 : vector<1x256xf32> to vector<8x256xf32>
    %5 = arith.addf %2, %4 : vector<8x256xf32>
    %cst_5 = arith.constant 0.000000e+00 : f32
    %6 = vector.broadcast %cst_5 : f32 to vector<8x256xf32>
    %7 = arith.maximumf %5, %6 : vector<8x256xf32>
    %8 = arith.truncf %7 : vector<8x256xf32> to vector<8x256xbf16>
    %c0_6 = arith.constant 0 : index
    %c0_7 = arith.constant 0 : index
    %9 = vector.load %arg4[%c0_6, %c0_7] : memref<256x128xbf16, #tpu.memory_space<vmem>>, vector<256x128xbf16>
    %cst_8 = arith.constant dense<0.000000e+00> : vector<8x128xf32>
    %10 = tpu.matmul %8, %9, %cst_8 {dimension_numbers = #tpu.dot_dimension_numbers<[1], [0], [0], [1], [0, 0, 1, 1], [], []>} : vector<8x256xbf16>, vector<256x128xbf16>, vector<8x128xf32> -> vector<8x128xf32>
    %c0_9 = arith.constant 0 : index
    %c0_10 = arith.constant 0 : index
    %11 = vector.load %arg5[%c0_9, %c0_10] : memref<1x128xf32, #tpu.memory_space<vmem>>, vector<1x128xf32>
    %12 = vector.broadcast %11 : vector<1x128xf32> to vector<8x128xf32>
    %13 = arith.addf %10, %12 : vector<8x128xf32>
    %cst_11 = arith.constant 0.000000e+00 : f32
    %14 = vector.broadcast %cst_11 : f32 to vector<8x128xf32>
    %15 = arith.maximumf %13, %14 : vector<8x128xf32>
    %16 = arith.truncf %15 : vector<8x128xf32> to vector<8x128xbf16>
    %c0_12 = arith.constant 0 : index
    %c0_13 = arith.constant 0 : index
    %17 = vector.load %arg6[%c0_12, %c0_13] : memref<128x128xbf16, #tpu.memory_space<vmem>>, vector<128x128xbf16>
    %cst_14 = arith.constant dense<0.000000e+00> : vector<8x128xf32>
    %18 = tpu.matmul %16, %17, %cst_14 {dimension_numbers = #tpu.dot_dimension_numbers<[1], [0], [0], [1], [0, 0, 1, 1], [], []>} : vector<8x128xbf16>, vector<128x128xbf16>, vector<8x128xf32> -> vector<8x128xf32>
    %c0_15 = arith.constant 0 : index
    %c0_16 = arith.constant 0 : index
    %19 = vector.load %arg7[%c0_15, %c0_16] : memref<1x128xf32, #tpu.memory_space<vmem>>, vector<1x128xf32>
    %20 = vector.broadcast %19 : vector<1x128xf32> to vector<8x128xf32>
    %21 = arith.addf %18, %20 : vector<8x128xf32>
    %c0_17 = arith.constant 0 : index
    %c0_18 = arith.constant 0 : index
    %22 = vector.load %arg8[%c0_17, %c0_18] : memref<8x128xf32, #tpu.memory_space<vmem>>, vector<8x128xf32>
    tpu.vector_store %arg8[%c0_17, %c0_18], %21 {strides = array<i32>} : memref<8x128xf32, #tpu.memory_space<vmem>>, vector<8x128xf32>,
    return
  }
  func.func @transform_0(%arg0: i32) -> (i32, i32) {
    %c0_i32 = arith.constant 0 : i32
    %c0_i32_0 = arith.constant 0 : i32
    %c0_i32_1 = arith.constant 0 : i32
    return %c0_i32, %c0_i32_0 : i32, i32
  }
  func.func @transform_1(%arg0: i32) -> (i32, i32) {
    %c0_i32 = arith.constant 0 : i32
    %c0_i32_0 = arith.constant 0 : i32
    %c0_i32_1 = arith.constant 0 : i32
    return %c0_i32, %c0_i32_0 : i32, i32
  }
  func.func @transform_2(%arg0: i32) -> (i32, i32) {
    %c0_i32 = arith.constant 0 : i32
    %c0_i32_0 = arith.constant 0 : i32
    %c0_i32_1 = arith.constant 0 : i32
    return %c0_i32, %c0_i32_0 : i32, i32
  }
  func.func @transform_3(%arg0: i32) -> (i32, i32) {
    %c0_i32 = arith.constant 0 : i32
    %c0_i32_0 = arith.constant 0 : i32
    %c0_i32_1 = arith.constant 0 : i32
    return %c0_i32, %c0_i32_0 : i32, i32
  }
  func.func @transform_4(%arg0: i32) -> (i32, i32) {
    %c0_i32 = arith.constant 0 : i32
    %c0_i32_0 = arith.constant 0 : i32
    %c0_i32_1 = arith.constant 0 : i32
    return %c0_i32, %c0_i32_0 : i32, i32
  }
  func.func @transform_5(%arg0: i32) -> (i32, i32) {
    %c0_i32 = arith.constant 0 : i32
    %c0_i32_0 = arith.constant 0 : i32
    %c0_i32_1 = arith.constant 0 : i32
    return %c0_i32, %c0_i32_0 : i32, i32
  }
  func.func @transform_6(%arg0: i32) -> (i32, i32) {
    %c0_i32 = arith.constant 0 : i32
    %c0_i32_0 = arith.constant 0 : i32
    %c0_i32_1 = arith.constant 0 : i32
    return %c0_i32, %c0_i32_0 : i32, i32
  }
  func.func @transform_7(%arg0: i32) -> (i32, i32) {
    %c0_i32 = arith.constant 0 : i32
    %c0_i32_0 = arith.constant 0 : i32
    %c0_i32_1 = arith.constant 0 : i32
    return %c0_i32, %c0_i32_0 : i32, i32
  }
}

</mosaic_0001>

<bundles_post_ra>
// kernel: _forward_impl.1
= control target key start
LH: loop header
LB: loop body
LE: loop exit
PB: predicated region body
PF: predicated region fallthrough
CT: control target
= control target key end

     0   :  { %12 = vsyncpa [#allocation3], 0  ;;  %s2098_s27 = smov [#allocation2]   ;;  %s2099_s29 = smov 128   ;;  %s2272_s0 = inlined_call_operand.vmem [shape: bf16[8,1024], index: 0, kind: input, shape index: {}]   ;;  %s2273_s1 = inlined_call_operand.hbm [shape: bf16[1024,256], index: 1, kind: input, shape index: {}]   ;;  %s2274_s2 = inlined_call_operand.vmem [shape: f32[1,256], index: 2, kind: input, shape index: {}]   ;;  %s2275_s3 = inlined_call_operand.vmem [shape: bf16[256,128], index: 3, kind: input, shape index: {}]   ;;  %s2276_s4 = inlined_call_operand.vmem [shape: f32[1,128], index: 4, kind: input, shape index: {}]   ;;  %s2277_s5 = inlined_call_operand.vmem [shape: bf16[128,128], index: 5, kind: input, shape index: {}]   ;;  %s2278_s6 = inlined_call_operand.vmem [shape: f32[1,128], index: 6, kind: input, shape index: {}]   ;;  %s2279_s7 = inlined_call_operand.vmem [shape: f32[8,128], index: 7, kind: output, shape index: {}]  }
   0x1   :  { %s19_s26 = sshll.u32 %s2273_s1, 4  ;;  %s21_s28 = sshll.u32 %s2098_s27, 4  ;;  %s20_s26 = int_to_ptr.hbm [resolvable:$true] %s19_s26  ;;  %s22_s28 = int_to_ptr.vmem [resolvable:$true] %s21_s28 }
   0x2   :  { %s2100_s30 = smov 8  }
   0x3   :  { %27 = dma.hbm_to_vmem [thread:$0]  %s20_s26, 16384, %s22_s28, [#allocation3], %s2099_s29, %s2099_s29, %s2100_s30  }
   0x4   :  { %2096 = dma.done.wait [#allocation3], 16384  }
   0x5   :  { %2097 = vsyncadd [#allocation3], 4294950912  ;;  %v1365_v0 = vld [vmem:[#allocation2 + $0x70] sm:$0xf]  ;;  %v1930_v1 = vld [vmem:[#allocation2 + $0x74] sm:$0xf0] }
   0x6   :  { %v1429_v2 = vld [vmem:[#allocation2 + $0xf0] sm:$0xf]  ;;  %v1366_v3 = vor.u32 %v1930_v1, %v1365_v0  ;;  %v1946_v4 = vld [vmem:[#allocation2 + $0xf4] sm:$0xf0]  ;;  %v1357_v11 = vld [vmem:[#allocation2 + $0x60] sm:$0xf] }
   0x7   :  { %v1493_v5 = vld [vmem:[#allocation2 + $0x170] sm:$0xf]  ;;  %v1962_v6 = vld [vmem:[#allocation2 + $0x174] sm:$0xf0]  ;;  %v1430_v7 = vor.u32 %v1946_v4, %v1429_v2  ;;  %v1928_v13 = vld [vmem:[#allocation2 + $0x64] sm:$0xf0] }
   0x8   :  { %v1494_v8 = vor.u32 %v1962_v6, %v1493_v5  ;;  %v1557_v9 = vld [vmem:[#allocation2 + $0x1f0] sm:$0xf]  ;;  %v1978_v10 = vld [vmem:[#allocation2 + $0x1f4] sm:$0xf0]  ;;  %848 = vmatpush.bf16.msra.mxu0 %v1366_v3  ;;  %v1421_v14 = vld [vmem:[#allocation2 + $0xe0] sm:$0xf]  ;;  %v1358_v16 = vor.u32 %v1928_v13, %v1357_v11 }
   0x9   :  { %v1558_v12 = vor.u32 %v1978_v10, %v1557_v9  ;;  %v1944_v15 = vld [vmem:[#allocation2 + $0xe4] sm:$0xf0]  ;;  %861 = vmatpush.bf16.msra.mxu1 %v1430_v7  ;;  %v1485_v18 = vld [vmem:[#allocation2 + $0x160] sm:$0xf]  ;;  %v1349_v23 = vld [vmem:[#allocation2 + $0x50] sm:$0xf] }
   0xa   :  { %874 = vmatpush.bf16.msra.mxu2 %v1494_v8  ;;  %v1422_v17 = vor.u32 %v1944_v15, %v1421_v14  ;;  %v1960_v19 = vld [vmem:[#allocation2 + $0x164] sm:$0xf0]  ;;  %v1549_v20 = vld [vmem:[#allocation2 + $0x1e0] sm:$0xf]  ;;  %v1926_v24 = vld [vmem:[#allocation2 + $0x54] sm:$0xf0] }
   0xb   :  { %887 = vmatpush.bf16.msra.mxu3 %v1558_v12  ;;  %v1486_v21 = vor.u32 %v1960_v19, %v1485_v18  ;;  %v1976_v22 = vld [vmem:[#allocation2 + $0x1e4] sm:$0xf0]  ;;  %v1413_v26 = vld [vmem:[#allocation2 + $0xd0] sm:$0xf]  ;;  %v1942_v27 = vld [vmem:[#allocation2 + $0xd4] sm:$0xf0]  ;;  %v1350_v29 = vor.u32 %v1926_v24, %v1349_v23 }
   0xc   :  { %v1550_v25 = vor.u32 %v1976_v22, %v1549_v20  ;;  %v1477_v28 = vld [vmem:[#allocation2 + $0x150] sm:$0xf]  ;;  %849 = vmatpush.bf16.msra.mxu0 %v1358_v16  ;;  %v1958_v30 = vld [vmem:[#allocation2 + $0x154] sm:$0xf0]  ;;  %v1414_v33 = vor.u32 %v1942_v27, %v1413_v26  ;;  %v1341_v35 = vld [vmem:[#allocation2 + $0x40] sm:$0xf] }
   0xd   :  { %v1541_v31 = vld [vmem:[#allocation2 + $0x1d0] sm:$0xf]  ;;  %v1974_v32 = vld [vmem:[#allocation2 + $0x1d4] sm:$0xf0]  ;;  %862 = vmatpush.bf16.msra.mxu1 %v1422_v17  ;;  %v1478_v34 = vor.u32 %v1958_v30, %v1477_v28  ;;  %v1924_v36 = vld [vmem:[#allocation2 + $0x44] sm:$0xf0] }
   0xe   :  { %875 = vmatpush.bf16.msra.mxu2 %v1486_v21  ;;  %v1405_v37 = vld [vmem:[#allocation2 + $0xc0] sm:$0xf]  ;;  %v1542_v38 = vor.u32 %v1974_v32, %v1541_v31  ;;  %v1940_v39 = vld [vmem:[#allocation2 + $0xc4] sm:$0xf0]  ;;  %v1342_v44 = vor.u32 %v1924_v36, %v1341_v35  ;;  %v1333_v47 = vld [vmem:[#allocation2 + $0x30] sm:$0xf] }
   0xf   :  { %888 = vmatpush.bf16.msra.mxu3 %v1550_v25  ;;  %v1469_v40 = vld [vmem:[#allocation2 + $0x140] sm:$0xf]  ;;  %v1956_v41 = vld [vmem:[#allocation2 + $0x144] sm:$0xf0]  ;;  %v1406_v45 = vor.u32 %v1940_v39, %v1405_v37  ;;  %v1922_v48 = vld [vmem:[#allocation2 + $0x34] sm:$0xf0] }
  0x10   :  { %v1533_v42 = vld [vmem:[#allocation2 + $0x1c0] sm:$0xf]  ;;  %v1972_v43 = vld [vmem:[#allocation2 + $0x1c4] sm:$0xf0]  ;;  %850 = vmatpush.bf16.msra.mxu0 %v1350_v29  ;;  %v1470_v46 = vor.u32 %v1956_v41, %v1469_v40  ;;  %v1397_v49 = vld [vmem:[#allocation2 + $0xb0] sm:$0xf]  ;;  %v1334_v56 = vor.u32 %v1922_v48, %v1333_v47 }
  0x11   :  { %863 = vmatpush.bf16.msra.mxu1 %v1414_v33  ;;  %v1534_v50 = vor.u32 %v1972_v43, %v1533_v42  ;;  %v1938_v51 = vld [vmem:[#allocation2 + $0xb4] sm:$0xf0]  ;;  %v1461_v52 = vld [vmem:[#allocation2 + $0x130] sm:$0xf]  ;;  %v1325_v59 = vld [vmem:[#allocation2 + $0x20] sm:$0xf] }
  0x12   :  { %876 = vmatpush.bf16.msra.mxu2 %v1478_v34  ;;  %v1954_v53 = vld [vmem:[#allocation2 + $0x134] sm:$0xf0]  ;;  %v1525_v54 = vld [vmem:[#allocation2 + $0x1b0] sm:$0xf]  ;;  %v1398_v57 = vor.u32 %v1938_v51, %v1397_v49  ;;  %v1920_v60 = vld [vmem:[#allocation2 + $0x24] sm:$0xf0] }
  0x13   :  { %889 = vmatpush.bf16.msra.mxu3 %v1542_v38  ;;  %v1970_v55 = vld [vmem:[#allocation2 + $0x1b4] sm:$0xf0]  ;;  %v1462_v58 = vor.u32 %v1954_v53, %v1461_v52  ;;  %v1389_v61 = vld [vmem:[#allocation2 + $0xa0] sm:$0xf]  ;;  %v1936_v63 = vld [vmem:[#allocation2 + $0xa4] sm:$0xf0]  ;;  %v1326_v4 = vor.u32 %v1920_v60, %v1325_v59 }
  0x14   :  { %851 = vmatpush.bf16.msra.mxu0 %v1342_v44  ;;  %v1526_v62 = vor.u32 %v1970_v55, %v1525_v54  ;;  %v1453_v0 = vld [vmem:[#allocation2 + $0x120] sm:$0xf]  ;;  %v1952_v1 = vld [vmem:[#allocation2 + $0x124] sm:$0xf0]  ;;  %v1390_v5 = vor.u32 %v1936_v63, %v1389_v61  ;;  %v1317_v7 = vld [vmem:[#allocation2 + $0x10] sm:$0xf] }
  0x15   :  { %864 = vmatpush.bf16.msra.mxu1 %v1406_v45  ;;  %v1517_v2 = vld [vmem:[#allocation2 + $0x1a0] sm:$0xf]  ;;  %v1968_v3 = vld [vmem:[#allocation2 + $0x1a4] sm:$0xf0]  ;;  %v1454_v6 = vor.u32 %v1952_v1, %v1453_v0  ;;  %v1918_v8 = vld [vmem:[#allocation2 + $0x14] sm:$0xf0] }
  0x16   :  { %877 = vmatpush.bf16.msra.mxu2 %v1470_v46  ;;  %v1381_v9 = vld [vmem:[#allocation2 + $0x90] sm:$0xf]  ;;  %v1518_v10 = vor.u32 %v1968_v3, %v1517_v2  ;;  %v1934_v11 = vld [vmem:[#allocation2 + $0x94] sm:$0xf0]  ;;  %v1318_v16 = vor.u32 %v1918_v8, %v1317_v7  ;;  %v1309_v17 = vld [vmem:[#allocation2] sm:$0xf] }
  0x17   :  { %890 = vmatpush.bf16.msra.mxu3 %v1534_v50  ;;  %v1445_v12 = vld [vmem:[#allocation2 + $0x110] sm:$0xf]  ;;  %v1950_v13 = vld [vmem:[#allocation2 + $0x114] sm:$0xf0]  ;;  %v1916_v18 = vld [vmem:[#allocation2 + $0x4] sm:$0xf0]  ;;  %v1382_v19 = vor.u32 %v1934_v11, %v1381_v9 }
  0x18   :  { %852 = vmatpush.bf16.msra.mxu0 %v1334_v56  ;;  %v1509_v14 = vld [vmem:[#allocation2 + $0x190] sm:$0xf]  ;;  %v1966_v15 = vld [vmem:[#allocation2 + $0x194] sm:$0xf0]  ;;  %v1446_v20 = vor.u32 %v1950_v13, %v1445_v12  ;;  %v1373_v21 = vld [vmem:[#allocation2 + $0x80] sm:$0xf]  ;;  %v1310_v31 = vor.u32 %v1916_v18, %v1309_v17 }
  0x19   :  { %865 = vmatpush.bf16.msra.mxu1 %v1398_v57  ;;  %v1932_v22 = vld [vmem:[#allocation2 + $0x84] sm:$0xf0]  ;;  %v1437_v23 = vld [vmem:[#allocation2 + $0x100] sm:$0xf]  ;;  %v1510_v24 = vor.u32 %v1966_v15, %v1509_v14  ;;  %v1621_v28 = vld [vmem:[#allocation2 + $0x270] sm:$0xf] }
  0x1a   :  { %878 = vmatpush.bf16.msra.mxu2 %v1462_v58  ;;  %v1948_v25 = vld [vmem:[#allocation2 + $0x104] sm:$0xf0]  ;;  %v1501_v26 = vld [vmem:[#allocation2 + $0x180] sm:$0xf]  ;;  %v1994_v29 = vld [vmem:[#allocation2 + $0x274] sm:$0xf0]  ;;  %v1374_v35 = vor.u32 %v1932_v22, %v1373_v21 }
  0x1b   :  { %891 = vmatpush.bf16.msra.mxu3 %v1526_v62  ;;  %v1964_v27 = vld [vmem:[#allocation2 + $0x184] sm:$0xf0]  ;;  %v1685_v30 = vld [vmem:[#allocation2 + $0x2f0] sm:$0xf]  ;;  %v2010_v32 = vld [vmem:[#allocation2 + $0x2f4] sm:$0xf0]  ;;  %v1438_v36 = vor.u32 %v1948_v25, %v1437_v23  ;;  %v1622_v40 = vor.u32 %v1994_v29, %v1621_v28 }
  0x1c   :  { %853 = vmatpush.bf16.msra.mxu0 %v1326_v4  ;;  %v1749_v33 = vld [vmem:[#allocation2 + $0x370] sm:$0xf]  ;;  %v2026_v34 = vld [vmem:[#allocation2 + $0x374] sm:$0xf0]  ;;  %v1502_v39 = vor.u32 %v1964_v27, %v1501_v26  ;;  %v1686_v41 = vor.u32 %v2010_v32, %v1685_v30  ;;  %v1613_v43 = vld [vmem:[#allocation2 + $0x260] sm:$0xf] }
  0x1d   :  { %866 = vmatpush.bf16.msra.mxu1 %v1390_v5  ;;  %v1813_v37 = vld [vmem:[#allocation2 + $0x3f0] sm:$0xf]  ;;  %v2042_v38 = vld [vmem:[#allocation2 + $0x3f4] sm:$0xf0]  ;;  %v1750_v42 = vor.u32 %v2026_v34, %v1749_v33  ;;  %v1992_v44 = vld [vmem:[#allocation2 + $0x264] sm:$0xf0] }
  0x1e   :  { %879 = vmatpush.bf16.msra.mxu2 %v1454_v6  ;;  %v1677_v45 = vld [vmem:[#allocation2 + $0x2e0] sm:$0xf]  ;;  %v1814_v46 = vor.u32 %v2042_v38, %v1813_v37  ;;  %v2008_v47 = vld [vmem:[#allocation2 + $0x2e4] sm:$0xf0]  ;;  %v1614_v53 = vor.u32 %v1992_v44, %v1613_v43  ;;  %v1605_v54 = vld [vmem:[#allocation2 + $0x250] sm:$0xf] }
  0x1f   :  { %892 = vmatpush.bf16.msra.mxu3 %v1518_v10  ;;  %v1741_v48 = vld [vmem:[#allocation2 + $0x360] sm:$0xf]  ;;  %v2024_v49 = vld [vmem:[#allocation2 + $0x364] sm:$0xf0]  ;;  %v1678_v57 = vor.u32 %v2008_v47, %v1677_v45  ;;  %v1990_v59 = vld [vmem:[#allocation2 + $0x254] sm:$0xf0] }
  0x20   :  { %854 = vmatpush.bf16.msra.mxu0 %v1318_v16  ;;  %v1805_v50 = vld [vmem:[#allocation2 + $0x3e0] sm:$0xf]  ;;  %v2040_v51 = vld [vmem:[#allocation2 + $0x3e4] sm:$0xf0]  ;;  %v1742_v58 = vor.u32 %v2024_v49, %v1741_v48  ;;  %v1669_v60 = vld [vmem:[#allocation2 + $0x2d0] sm:$0xf]  ;;  %v1606_v8 = vor.u32 %v1990_v59, %v1605_v54 }
  0x21   :  { %867 = vmatpush.bf16.msra.mxu1 %v1382_v19  ;;  %v43_v52 = vld [vmem:[%s2272_s0 + $0x8] sm:$0xff]  ;;  %v2006_v61 = vld [vmem:[#allocation2 + $0x2d4] sm:$0xf0]  ;;  %v1806_v62 = vor.u32 %v2040_v51, %v1805_v50  ;;  %v1733_v63 = vld [vmem:[#allocation2 + $0x350] sm:$0xf] }
  0x22   :  { %880 = vmatpush.bf16.msra.mxu2 %v1446_v20  ;;  %v186_v55 = vunpack.c.l.b16 %v43_v52  ;;  %v187_v56 = vunpack.c.h.b16 %v43_v52  ;;  %v2022_v0 = vld [vmem:[#allocation2 + $0x354] sm:$0xf0]  ;;  %v42_v2 = vld [vmem:[%s2272_s0] sm:$0xff]  ;;  %v1797_v3 = vld [vmem:[#allocation2 + $0x3d0] sm:$0xf]  ;;  %v1670_v9 = vor.u32 %v2006_v61, %v1669_v60 }
  0x23   :  { %893 = vmatpush.bf16.msra.mxu3 %v1510_v24  ;;  %v2038_v4 = vld [vmem:[#allocation2 + $0x3d4] sm:$0xf0]  ;;  %v184_v5 = vunpack.c.l.b16 %v42_v2  ;;  %v185_v7 = vunpack.c.h.b16 %v42_v2  ;;  %v1734_v10 = vor.u32 %v2022_v0, %v1733_v63  ;;  %v1597_v11 = vld [vmem:[#allocation2 + $0x240] sm:$0xf]  ;;  %v1988_v12 = vld [vmem:[#allocation2 + $0x244] sm:$0xf0] }
  0x24   :  { %855 = vmatpush.bf16.msra.mxu0 %v1310_v31  ;;  %v2147_v1 = vpack.c.b16 %v186_v55, %v186_v55  ;;  %v2152_v6 = vpack.c.b16 %v187_v56, %v187_v56  ;;  %v1661_v13 = vld [vmem:[#allocation2 + $0x2c0] sm:$0xf]  ;;  %v1798_v16 = vor.u32 %v2038_v4, %v1797_v3  ;;  %v2004_v17 = vld [vmem:[#allocation2 + $0x2c4] sm:$0xf0]  ;;  %v1598_v22 = vor.u32 %v1988_v12, %v1597_v11  ;;  %v1589_v25 = vld [vmem:[#allocation2 + $0x230] sm:$0xf] }
  0x25   :  { %868 = vmatpush.bf16.msra.mxu1 %v1374_v35  ;;  %v2155_v14 = vpack.c.b16 %v184_v5, %v184_v5  ;;  %v2157_v15 = vpack.c.b16 %v185_v7, %v185_v7  ;;  %v1725_v18 = vld [vmem:[#allocation2 + $0x340] sm:$0xf]  ;;  %v2020_v19 = vld [vmem:[#allocation2 + $0x344] sm:$0xf0]  ;;  %v1662_v23 = vor.u32 %v2004_v17, %v1661_v13  ;;  %v1986_v26 = vld [vmem:[#allocation2 + $0x234] sm:$0xf0] }
  0x26   :  { %881 = vmatpush.bf16.msra.mxu2 %v1438_v36  ;;  %v1789_v20 = vld [vmem:[#allocation2 + $0x3c0] sm:$0xf]  ;;  %v2036_v21 = vld [vmem:[#allocation2 + $0x3c4] sm:$0xf0]  ;;  %v1726_v24 = vor.u32 %v2020_v19, %v1725_v18  ;;  %v1653_v27 = vld [vmem:[#allocation2 + $0x2b0] sm:$0xf]  ;;  %v1590_v34 = vor.u32 %v1986_v26, %v1589_v25 }
  0x27   :  { %894 = vmatpush.bf16.msra.mxu3 %v1502_v39  ;;  %856 = vmatmul.bf16.vlgmr.msra.gmra.mxu0 %v2155_v14  ;;  %v1790_v28 = vor.u32 %v2036_v21, %v1789_v20  ;;  %v2002_v29 = vld [vmem:[#allocation2 + $0x2b4] sm:$0xf0]  ;;  %v1717_v30 = vld [vmem:[#allocation2 + $0x330] sm:$0xf]  ;;  %v1581_v37 = vld [vmem:[#allocation2 + $0x220] sm:$0xf] }
  0x28   :  { %900 = vmatpush.bf16.msrb.mxu0 %v1622_v40  ;;  %869 = vmatmul.bf16.vlgmr.msra.gmra.mxu1 %v2157_v15  ;;  %v2018_v31 = vld [vmem:[#allocation2 + $0x334] sm:$0xf0]  ;;  %v1781_v32 = vld [vmem:[#allocation2 + $0x3b0] sm:$0xf]  ;;  %v1654_v35 = vor.u32 %v2002_v29, %v1653_v27  ;;  %v1984_v38 = vld [vmem:[#allocation2 + $0x224] sm:$0xf0] }
  0x29   :  { %913 = vmatpush.bf16.msrb.mxu1 %v1686_v41  ;;  %882 = vmatmul.bf16.vlgmr.msra.gmra.mxu2 %v2147_v1  ;;  %v2034_v33 = vld [vmem:[#allocation2 + $0x3b4] sm:$0xf0]  ;;  %v1718_v36 = vor.u32 %v2018_v31, %v1717_v30  ;;  %v1645_v39 = vld [vmem:[#allocation2 + $0x2a0] sm:$0xf]  ;;  %v2000_v41 = vld [vmem:[#allocation2 + $0x2a4] sm:$0xf0] }
  0x2a   :  { %926 = vmatpush.bf16.msrb.mxu2 %v1750_v42  ;;  %895 = vmatmul.bf16.vlgmr.msra.gmra.mxu3 %v2152_v6  ;;  %v1782_v40 = vor.u32 %v2034_v33, %v1781_v32  ;;  %v1709_v42 = vld [vmem:[#allocation2 + $0x320] sm:$0xf]  ;;  %v2016_v43 = vld [vmem:[#allocation2 + $0x324] sm:$0xf0]  ;;  %v1646_v47 = vor.u32 %v2000_v41, %v1645_v39  ;;  %v1573_v49 = vld [vmem:[#allocation2 + $0x210] sm:$0xf] }
  0x2b   :  { %939 = vmatpush.bf16.msrb.mxu3 %v1814_v46  ;;  %v1773_v44 = vld [vmem:[#allocation2 + $0x3a0] sm:$0xf]  ;;  %v2032_v45 = vld [vmem:[#allocation2 + $0x3a4] sm:$0xf0]  ;;  %v1582_v46 = vor.u32 %v1984_v38, %v1581_v37  ;;  %v1710_v48 = vor.u32 %v2016_v43, %v1709_v42  ;;  %v1982_v50 = vld [vmem:[#allocation2 + $0x214] sm:$0xf0] }
  0x2c   :  { %901 = vmatpush.bf16.msrb.mxu0 %v1614_v53  ;;  %v1637_v51 = vld [vmem:[#allocation2 + $0x290] sm:$0xf]  ;;  %v1774_v52 = vor.u32 %v2032_v45, %v1773_v44  ;;  %v1998_v53 = vld [vmem:[#allocation2 + $0x294] sm:$0xf0]  ;;  %v1574_v59 = vor.u32 %v1982_v50, %v1573_v49  ;;  %v1980_v60 = vld [vmem:[#allocation2 + $0x204] sm:$0xf0] }
  0x2d   :  { %914 = vmatpush.bf16.msrb.mxu1 %v1678_v57  ;;  %v1701_v54 = vld [vmem:[#allocation2 + $0x310] sm:$0xf]  ;;  %v2014_v55 = vld [vmem:[#allocation2 + $0x314] sm:$0xf0]  ;;  %v1629_v61 = vld [vmem:[#allocation2 + $0x280] sm:$0xf]  ;;  %v1638_v63 = vor.u32 %v1998_v53, %v1637_v51 }
  0x2e   :  { %927 = vmatpush.bf16.msrb.mxu2 %v1742_v58  ;;  %v1765_v56 = vld [vmem:[#allocation2 + $0x390] sm:$0xf]  ;;  %v2030_v57 = vld [vmem:[#allocation2 + $0x394] sm:$0xf0]  ;;  %v1565_v58 = vld [vmem:[#allocation2 + $0x200] sm:$0xf]  ;;  %v1702_v0 = vor.u32 %v2014_v55, %v1701_v54 }
  0x2f   :  { %940 = vmatpush.bf16.msrb.mxu3 %v1806_v62  ;;  %v1996_v62 = vld [vmem:[#allocation2 + $0x284] sm:$0xf0]  ;;  %v1693_v2 = vld [vmem:[#allocation2 + $0x300] sm:$0xf]  ;;  %v45_v4 = vld [vmem:[%s2272_s0 + $0x18] sm:$0xff]  ;;  %v1766_v5 = vor.u32 %v2030_v57, %v1765_v56  ;;  %v1566_v13 = vor.u32 %v1980_v60, %v1565_v58 }
  0x30   :  { %902 = vmatpush.bf16.msrb.mxu0 %v1606_v8  ;;  %v2012_v3 = vld [vmem:[#allocation2 + $0x304] sm:$0xf0]  ;;  %v1757_v7 = vld [vmem:[#allocation2 + $0x380] sm:$0xf]  ;;  %v1367_v11 = vld [vmem:[#allocation2 + $0x78] sm:$0xf0]  ;;  %v190_v19 = vunpack.c.l.b16 %v45_v4  ;;  %v1630_v20 = vor.u32 %v1996_v62, %v1629_v61  ;;  %v191_v25 = vunpack.c.h.b16 %v45_v4 }
  0x31   :  { %915 = vmatpush.bf16.msrb.mxu1 %v1670_v9  ;;  %v2028_v8 = vld [vmem:[#allocation2 + $0x384] sm:$0xf0]  ;;  %v44_v9 = vld [vmem:[%s2272_s0 + $0x10] sm:$0xff]  ;;  %v1495_v18 = vld [vmem:[#allocation2 + $0x178] sm:$0xf0]  ;;  %v1694_v21 = vor.u32 %v2012_v3, %v1693_v2 }
  0x32   :  { %928 = vmatpush.bf16.msrb.mxu2 %v1734_v10  ;;  %v1929_v10 = vld [vmem:[#allocation2 + $0x74] sm:$0xf]  ;;  %v1758_v26 = vor.u32 %v2028_v8, %v1757_v7  ;;  %v1927_v31 = vld [vmem:[#allocation2 + $0x64] sm:$0xf]  ;;  %v1359_v32 = vld [vmem:[#allocation2 + $0x68] sm:$0xf0] }
  0x33   :  { %941 = vmatpush.bf16.msrb.mxu3 %v1798_v16  ;;  %v1945_v12 = vld [vmem:[#allocation2 + $0xf4] sm:$0xf]  ;;  %v1431_v16 = vld [vmem:[#allocation2 + $0xf8] sm:$0xf0]  ;;  %v1370_v27 = vor.u32 %v1929_v10, %v1367_v11  ;;  %v1943_v33 = vld [vmem:[#allocation2 + $0xe4] sm:$0xf]  ;;  %v1362_v43 = vor.u32 %v1927_v31, %v1359_v32 }
  0x34   :  { %903 = vmatpush.bf16.msrb.mxu0 %v1598_v22  ;;  %v1961_v17 = vld [vmem:[#allocation2 + $0x174] sm:$0xf]  ;;  %v1434_v29 = vor.u32 %v1945_v12, %v1431_v16  ;;  %v1959_v37 = vld [vmem:[#allocation2 + $0x164] sm:$0xf]  ;;  %v1487_v38 = vld [vmem:[#allocation2 + $0x168] sm:$0xf0] }
  0x35   :  { %916 = vmatpush.bf16.msrb.mxu1 %v1662_v23  ;;  %v1977_v22 = vld [vmem:[#allocation2 + $0x1f4] sm:$0xf]  ;;  %v1559_v23 = vld [vmem:[#allocation2 + $0x1f8] sm:$0xf0]  ;;  %v1498_v30 = vor.u32 %v1961_v17, %v1495_v18  ;;  %v1975_v41 = vld [vmem:[#allocation2 + $0x1e4] sm:$0xf] }
  0x36   :  { %929 = vmatpush.bf16.msrb.mxu2 %v1726_v24  ;;  %v188_v24 = vunpack.c.l.b16 %v44_v9  ;;  %v1551_v42 = vld [vmem:[#allocation2 + $0x1e8] sm:$0xf0]  ;;  %v1941_v49 = vld [vmem:[#allocation2 + $0xd4] sm:$0xf]  ;;  %v1415_v51 = vld [vmem:[#allocation2 + $0xd8] sm:$0xf0] }
  0x37   :  { %942 = vmatpush.bf16.msrb.mxu3 %v1790_v28  ;;  %v189_v28 = vunpack.c.h.b16 %v44_v9  ;;  %v1554_v50 = vor.u32 %v1975_v41, %v1551_v42  ;;  %v1479_v53 = vld [vmem:[#allocation2 + $0x158] sm:$0xf0]  ;;  %v1973_v54 = vld [vmem:[#allocation2 + $0x1d4] sm:$0xf]  ;;  %v1418_v57 = vor.u32 %v1941_v49, %v1415_v51  ;;  %v1343_v60 = vld [vmem:[#allocation2 + $0x48] sm:$0xf0] }
  0x38   :  { %904 = vmatpush.bf16.msrb.mxu0 %v1590_v34  ;;  %v1562_v34 = vor.u32 %v1977_v22, %v1559_v23  ;;  %v2170_v39 = vpack.c.b16 %v188_v24, %v188_v24  ;;  %v1543_v55 = vld [vmem:[#allocation2 + $0x1d8] sm:$0xf0]  ;;  %v1939_v61 = vld [vmem:[#allocation2 + $0xc4] sm:$0xf]  ;;  %v1471_v2 = vld [vmem:[#allocation2 + $0x148] sm:$0xf0] }
  0x39   :  { %917 = vmatpush.bf16.msrb.mxu1 %v1654_v35  ;;  %v2168_v35 = vpack.c.b16 %v190_v19, %v190_v19  ;;  %v2174_v44 = vpack.c.b16 %v189_v28, %v189_v28  ;;  %v1546_v62 = vor.u32 %v1973_v54, %v1543_v55  ;;  %v1971_v3 = vld [vmem:[#allocation2 + $0x1c4] sm:$0xf]  ;;  %v1535_v4 = vld [vmem:[#allocation2 + $0x1c8] sm:$0xf0]  ;;  %v1921_v9 = vld [vmem:[#allocation2 + $0x34] sm:$0xf] }
  0x3a   :  { %930 = vmatpush.bf16.msrb.mxu2 %v1718_v36  ;;  %v1423_v36 = vld [vmem:[#allocation2 + $0xe8] sm:$0xf0]  ;;  %v1335_v10 = vld [vmem:[#allocation2 + $0x38] sm:$0xf0]  ;;  %v1937_v11 = vld [vmem:[#allocation2 + $0xb4] sm:$0xf]  ;;  %v1538_v12 = vor.u32 %v1971_v3, %v1535_v4 }
  0x3b   :  { %943 = vmatpush.bf16.msrb.mxu3 %v1782_v40  ;;  %v2172_v40 = vpack.c.b16 %v191_v25, %v191_v25  ;;  %v1426_v45 = vor.u32 %v1943_v33, %v1423_v36  ;;  %v1953_v16 = vld [vmem:[#allocation2 + $0x134] sm:$0xf]  ;;  %v1463_v17 = vld [vmem:[#allocation2 + $0x138] sm:$0xf0]  ;;  %v1919_v23 = vld [vmem:[#allocation2 + $0x24] sm:$0xf] }
  0x3c   :  { %905 = vmatpush.bf16.msrb.mxu0 %v1582_v46  ;;  %v1490_v46 = vor.u32 %v1959_v37, %v1487_v38  ;;  %v1969_v18 = vld [vmem:[#allocation2 + $0x1b4] sm:$0xf]  ;;  %v1527_v19 = vld [vmem:[#allocation2 + $0x1b8] sm:$0xf0]  ;;  %v1466_v22 = vor.u32 %v1953_v16, %v1463_v17  ;;  %v1327_v24 = vld [vmem:[#allocation2 + $0x28] sm:$0xf0] }
  0x3d   :  { %918 = vmatpush.bf16.msrb.mxu1 %v1646_v47  ;;  %v1925_v47 = vld [vmem:[#allocation2 + $0x54] sm:$0xf]  ;;  %v1935_v25 = vld [vmem:[#allocation2 + $0xa4] sm:$0xf]  ;;  %v1519_v31 = vld [vmem:[#allocation2 + $0x1a8] sm:$0xf0]  ;;  %v1330_v32 = vor.u32 %v1919_v23, %v1327_v24 }
  0x3e   :  { %931 = vmatpush.bf16.msrb.mxu2 %v1710_v48  ;;  %v1351_v48 = vld [vmem:[#allocation2 + $0x58] sm:$0xf0]  ;;  %v1951_v28 = vld [vmem:[#allocation2 + $0x124] sm:$0xf]  ;;  %v1917_v36 = vld [vmem:[#allocation2 + $0x14] sm:$0xf] }
  0x3f   :  { %944 = vmatpush.bf16.msrb.mxu3 %v1774_v52  ;;  %v1957_v52 = vld [vmem:[#allocation2 + $0x154] sm:$0xf]  ;;  %v1354_v56 = vor.u32 %v1925_v47, %v1351_v48  ;;  %v1319_v37 = vld [vmem:[#allocation2 + $0x18] sm:$0xf0]  ;;  %v1915_v49 = vld [vmem:[#allocation2 + $0x4] sm:$0xf] }
  0x40   :  { %906 = vmatpush.bf16.msrb.mxu0 %v1574_v59  ;;  %v1482_v58 = vor.u32 %v1957_v52, %v1479_v53  ;;  %v1923_v59 = vld [vmem:[#allocation2 + $0x44] sm:$0xf]  ;;  %v1933_v38 = vld [vmem:[#allocation2 + $0x94] sm:$0xf]  ;;  %v1383_v42 = vld [vmem:[#allocation2 + $0x98] sm:$0xf0]  ;;  %v1322_v48 = vor.u32 %v1917_v36, %v1319_v37 }
  0x41   :  { %919 = vmatpush.bf16.msrb.mxu1 %v1638_v63  ;;  %v1407_v63 = vld [vmem:[#allocation2 + $0xc8] sm:$0xf0]  ;;  %v1511_v47 = vld [vmem:[#allocation2 + $0x198] sm:$0xf0]  ;;  %v1386_v51 = vor.u32 %v1933_v38, %v1383_v42  ;;  %v1931_v53 = vld [vmem:[#allocation2 + $0x84] sm:$0xf] }
  0x42   :  { %932 = vmatpush.bf16.msrb.mxu2 %v1702_v0  ;;  %v1955_v0 = vld [vmem:[#allocation2 + $0x144] sm:$0xf]  ;;  %v1410_v7 = vor.u32 %v1939_v61, %v1407_v63  ;;  %v1375_v54 = vld [vmem:[#allocation2 + $0x88] sm:$0xf0]  ;;  %v1623_v61 = vld [vmem:[#allocation2 + $0x278] sm:$0xf0] }
  0x43   :  { %945 = vmatpush.bf16.msrb.mxu3 %v1766_v5  ;;  %v1346_v5 = vor.u32 %v1923_v59, %v1343_v60  ;;  %v1474_v8 = vor.u32 %v1955_v0, %v1471_v2  ;;  %v1947_v55 = vld [vmem:[#allocation2 + $0x104] sm:$0xf]  ;;  %v1503_v59 = vld [vmem:[#allocation2 + $0x188] sm:$0xf0]  ;;  %v1993_v60 = vld [vmem:[#allocation2 + $0x274] sm:$0xf]  ;;  %v1378_v4 = vor.u32 %v1931_v53, %v1375_v54 }
  0x44   :  { %907 = vmatpush.bf16.msrb.mxu0 %v1566_v13  ;;  %v1399_v13 = vld [vmem:[#allocation2 + $0xb8] sm:$0xf0]  ;;  %v2025_v2 = vld [vmem:[#allocation2 + $0x374] sm:$0xf]  ;;  %v1615_v16 = vld [vmem:[#allocation2 + $0x268] sm:$0xf0] }
  0x45   :  { %920 = vmatpush.bf16.msrb.mxu1 %v1630_v20  ;;  %v1338_v20 = vor.u32 %v1921_v9, %v1335_v10  ;;  %v1687_v0 = vld [vmem:[#allocation2 + $0x2f8] sm:$0xf0]  ;;  %v1626_v10 = vor.u32 %v1993_v60, %v1623_v61  ;;  %v2007_v17 = vld [vmem:[#allocation2 + $0x2e4] sm:$0xf]  ;;  %v1807_v23 = vld [vmem:[#allocation2 + $0x3e8] sm:$0xf0] }
  0x46   :  { %933 = vmatpush.bf16.msrb.mxu2 %v1694_v21  ;;  %v1402_v21 = vor.u32 %v1937_v11, %v1399_v13  ;;  %v1751_v3 = vld [vmem:[#allocation2 + $0x378] sm:$0xf0]  ;;  %v1991_v13 = vld [vmem:[#allocation2 + $0x264] sm:$0xf]  ;;  %v2001_v53 = vld [vmem:[#allocation2 + $0x2b4] sm:$0xf] }
  0x47   :  { %946 = vmatpush.bf16.msrb.mxu3 %v1758_v26  ;;  %908 = vmatmul.bf16.vlgmr.msrb.gmra.mxu0 %v2170_v39  ;;  %v1530_v26 = vor.u32 %v1969_v18, %v1527_v19  ;;  %v1679_v19 = vld [vmem:[#allocation2 + $0x2e8] sm:$0xf0]  ;;  %v1618_v24 = vor.u32 %v1991_v13, %v1615_v16  ;;  %v1799_v36 = vld [vmem:[#allocation2 + $0x3d8] sm:$0xf0]  ;;  %v1987_v42 = vld [vmem:[#allocation2 + $0x244] sm:$0xf] }
  0x48   :  { %952 = vmatpush.bf16.msra.mxu0 %v1370_v27  ;;  %921 = vmatmul.bf16.vlgmr.msrb.gmra.mxu1 %v2174_v44  ;;  %v1391_v27 = vld [vmem:[#allocation2 + $0xa8] sm:$0xf0]  ;;  %v1981_v13 = vld [vmem:[#allocation2 + $0x214] sm:$0xf]  ;;  %v1575_v16 = vld [vmem:[#allocation2 + $0x218] sm:$0xf0] }
  0x49   :  { %965 = vmatpush.bf16.msra.mxu1 %v1434_v29  ;;  %934 = vmatmul.bf16.vlgmr.msrb.gmra.mxu2 %v2168_v35  ;;  %v1455_v29 = vld [vmem:[#allocation2 + $0x128] sm:$0xf0]  ;;  %v1394_v33 = vor.u32 %v1935_v25, %v1391_v27  ;;  %v1682_v25 = vor.u32 %v2007_v17, %v1679_v19  ;;  %v1989_v27 = vld [vmem:[#allocation2 + $0x254] sm:$0xf]  ;;  %v1639_v19 = vld [vmem:[#allocation2 + $0x298] sm:$0xf0] }
  0x4a   :  { %978 = vmatpush.bf16.msra.mxu2 %v1498_v30  ;;  %947 = vmatmul.bf16.vlgmr.msrb.gmra.mxu3 %v2172_v40  ;;  %v1967_v30 = vld [vmem:[#allocation2 + $0x1a4] sm:$0xf]  ;;  %v1997_v17 = vld [vmem:[#allocation2 + $0x294] sm:$0xf] }
  0x4b   :  { %991 = vmatpush.bf16.msra.mxu3 %v1562_v34  ;;  %v1458_v34 = vor.u32 %v1951_v28, %v1455_v29  ;;  %v1522_v41 = vor.u32 %v1967_v30, %v1519_v31  ;;  %v1607_v28 = vld [vmem:[#allocation2 + $0x258] sm:$0xf0]  ;;  %v2005_v29 = vld [vmem:[#allocation2 + $0x2d4] sm:$0xf] }
  0x4c   :  { %953 = vmatpush.bf16.msra.mxu0 %v1362_v43  ;;  %v1949_v43 = vld [vmem:[#allocation2 + $0x114] sm:$0xf]  ;;  %v1671_v31 = vld [vmem:[#allocation2 + $0x2d8] sm:$0xf0]  ;;  %v1610_v37 = vor.u32 %v1989_v27, %v1607_v28  ;;  %v1979_v27 = vld [vmem:[#allocation2 + $0x204] sm:$0xf] }
  0x4d   :  { %966 = vmatpush.bf16.msra.mxu1 %v1426_v45  ;;  %v1447_v45 = vld [vmem:[#allocation2 + $0x118] sm:$0xf0]  ;;  %v1674_v38 = vor.u32 %v2005_v29, %v1671_v31  ;;  %v1567_v28 = vld [vmem:[#allocation2 + $0x208] sm:$0xf0]  ;;  %v1995_v29 = vld [vmem:[#allocation2 + $0x284] sm:$0xf] }
  0x4e   :  { %979 = vmatpush.bf16.msra.mxu2 %v1490_v46  ;;  %v1965_v46 = vld [vmem:[#allocation2 + $0x194] sm:$0xf]  ;;  %v1450_v52 = vor.u32 %v1949_v43, %v1447_v45  ;;  %v1599_v43 = vld [vmem:[#allocation2 + $0x248] sm:$0xf0] }
  0x4f   :  { %992 = vmatpush.bf16.msra.mxu3 %v1554_v50  ;;  %v1311_v50 = vld [vmem:[#allocation2 + $0x8] sm:$0xf0] }
  0x50   :  { %954 = vmatpush.bf16.msra.mxu0 %v1354_v56  ;;  %v1514_v56 = vor.u32 %v1965_v46, %v1511_v47  ;;  %v1314_v63 = vor.u32 %v1915_v49, %v1311_v50  ;;  %v1663_v46 = vld [vmem:[#allocation2 + $0x2c8] sm:$0xf0]  ;;  %v2019_v47 = vld [vmem:[#allocation2 + $0x344] sm:$0xf] }
  0x51   :  { %967 = vmatpush.bf16.msra.mxu1 %v1418_v57  ;;  %v1439_v57 = vld [vmem:[#allocation2 + $0x108] sm:$0xf0]  ;;  %v2035_v49 = vld [vmem:[#allocation2 + $0x3c4] sm:$0xf] }
  0x52   :  { %980 = vmatpush.bf16.msra.mxu2 %v1482_v58  ;;  %v1963_v58 = vld [vmem:[#allocation2 + $0x184] sm:$0xf]  ;;  %v1631_v31 = vld [vmem:[#allocation2 + $0x288] sm:$0xf0] }
  0x53   :  { %993 = vmatpush.bf16.msra.mxu3 %v1546_v62  ;;  %v2009_v62 = vld [vmem:[#allocation2 + $0x2f4] sm:$0xf]  ;;  %v1506_v9 = vor.u32 %v1963_v58, %v1503_v59  ;;  %v1783_v59 = vld [vmem:[#allocation2 + $0x3b8] sm:$0xf0] }
  0x54   :  { %955 = vmatpush.bf16.msra.mxu0 %v1346_v5  ;;  %v1442_v5 = vor.u32 %v1947_v55, %v1439_v57  ;;  %v1690_v11 = vor.u32 %v2009_v62, %v1687_v0  ;;  %v1655_v55 = vld [vmem:[#allocation2 + $0x2b8] sm:$0xf0]  ;;  %v2033_v58 = vld [vmem:[#allocation2 + $0x3b4] sm:$0xf]  ;;  %v1583_v0 = vld [vmem:[#allocation2 + $0x228] sm:$0xf0] }
  0x55   :  { %968 = vmatpush.bf16.msra.mxu1 %v1410_v7  ;;  %v2041_v7 = vld [vmem:[#allocation2 + $0x3f4] sm:$0xf]  ;;  %v1719_v57 = vld [vmem:[#allocation2 + $0x338] sm:$0xf0]  ;;  %v1658_v61 = vor.u32 %v2001_v53, %v1655_v55 }
  0x56   :  { %981 = vmatpush.bf16.msra.mxu2 %v1474_v8  ;;  %v1815_v8 = vld [vmem:[#allocation2 + $0x3f8] sm:$0xf0] }
  0x57   :  { %994 = vmatpush.bf16.msra.mxu3 %v1538_v12  ;;  %v1754_v12 = vor.u32 %v2025_v2, %v1751_v3  ;;  %v1818_v18 = vor.u32 %v2041_v7, %v1815_v8  ;;  %v1999_v2 = vld [vmem:[#allocation2 + $0x2a4] sm:$0xf]  ;;  %v1786_v3 = vor.u32 %v2033_v58, %v1783_v59  ;;  %v1711_v7 = vld [vmem:[#allocation2 + $0x328] sm:$0xf0] }
  0x58   :  { %956 = vmatpush.bf16.msra.mxu0 %v1338_v20  ;;  %v2023_v20 = vld [vmem:[#allocation2 + $0x364] sm:$0xf] }
  0x59   :  { %969 = vmatpush.bf16.msra.mxu1 %v1402_v21  ;;  %v1743_v21 = vld [vmem:[#allocation2 + $0x368] sm:$0xf0]  ;;  %v2031_v8 = vld [vmem:[#allocation2 + $0x3a4] sm:$0xf] }
  0x5a   :  { %982 = vmatpush.bf16.msra.mxu2 %v1466_v22  ;;  %v2039_v22 = vld [vmem:[#allocation2 + $0x3e4] sm:$0xf] }
  0x5b   :  { %995 = vmatpush.bf16.msra.mxu3 %v1530_v26  ;;  %v1746_v26 = vor.u32 %v2023_v20, %v1743_v21  ;;  %v1810_v30 = vor.u32 %v2039_v22, %v1807_v23  ;;  %v2013_v20 = vld [vmem:[#allocation2 + $0x314] sm:$0xf]  ;;  %v1703_v21 = vld [vmem:[#allocation2 + $0x318] sm:$0xf0] }
  0x5c   :  { %957 = vmatpush.bf16.msra.mxu0 %v1330_v32  ;;  %v2021_v32 = vld [vmem:[#allocation2 + $0x354] sm:$0xf]  ;;  %v1767_v23 = vld [vmem:[#allocation2 + $0x398] sm:$0xf0] }
  0x5d   :  { %970 = vmatpush.bf16.msra.mxu1 %v1394_v33  ;;  %v1735_v33 = vld [vmem:[#allocation2 + $0x358] sm:$0xf0]  ;;  %v2029_v22 = vld [vmem:[#allocation2 + $0x394] sm:$0xf] }
  0x5e   :  { %983 = vmatpush.bf16.msra.mxu2 %v1458_v34  ;;  %v2037_v34 = vld [vmem:[#allocation2 + $0x3d4] sm:$0xf] }
  0x5f   :  { %996 = vmatpush.bf16.msra.mxu3 %v1522_v41  ;;  %v1738_v41 = vor.u32 %v2021_v32, %v1735_v33  ;;  %v1802_v45 = vor.u32 %v2037_v34, %v1799_v36  ;;  %v2011_v32 = vld [vmem:[#allocation2 + $0x304] sm:$0xf]  ;;  %v1695_v33 = vld [vmem:[#allocation2 + $0x308] sm:$0xf0] }
  0x60   :  { %958 = vmatpush.bf16.msra.mxu0 %v1322_v48  ;;  %v1727_v48 = vld [vmem:[#allocation2 + $0x348] sm:$0xf0]  ;;  %v2027_v34 = vld [vmem:[#allocation2 + $0x384] sm:$0xf] }
  0x61   :  { %971 = vmatpush.bf16.msra.mxu1 %v1386_v51  ;;  %v1985_v51 = vld [vmem:[#allocation2 + $0x234] sm:$0xf]  ;;  %v1759_v36 = vld [vmem:[#allocation2 + $0x388] sm:$0xf0] }
  0x62   :  { %984 = vmatpush.bf16.msra.mxu2 %v1450_v52  ;;  %v1591_v52 = vld [vmem:[#allocation2 + $0x238] sm:$0xf0] }
  0x63   :  { %997 = vmatpush.bf16.msra.mxu3 %v1514_v56  ;;  %v2017_v56 = vld [vmem:[#allocation2 + $0x334] sm:$0xf]  ;;  %v1594_v60 = vor.u32 %v1985_v51, %v1591_v52 }
  0x64   :  { %959 = vmatpush.bf16.msra.mxu0 %v1314_v63  ;;  %v1722_v62 = vor.u32 %v2017_v56, %v1719_v57  ;;  %v1983_v63 = vld [vmem:[#allocation2 + $0x224] sm:$0xf] }
  0x65   :  { %972 = vmatpush.bf16.msra.mxu1 %v1378_v4  ;;  %v1647_v4 = vld [vmem:[#allocation2 + $0x2a8] sm:$0xf0] }
  0x66   :  { %985 = vmatpush.bf16.msra.mxu2 %v1442_v5  ;;  %v2015_v5 = vld [vmem:[#allocation2 + $0x324] sm:$0xf] }
  0x67   :  { %998 = vmatpush.bf16.msra.mxu3 %v1506_v9  ;;  %960 = vmatmul.bf16.vlgmr.msra.gmra.mxu0 %v2155_v14  ;;  %v1791_v14 = vld [vmem:[#allocation2 + $0x3c8] sm:$0xf0] }
  0x68   :  { %1004 = vmatpush.bf16.msrb.mxu0 %v1626_v10  ;;  %973 = vmatmul.bf16.vlgmr.msra.gmra.mxu1 %v2157_v15  ;;  %v1730_v15 = vor.u32 %v2019_v47, %v1727_v48  ;;  %v1794_v54 = vor.u32 %v2035_v49, %v1791_v14  ;;  %v1775_v9 = vld [vmem:[#allocation2 + $0x3a8] sm:$0xf0]  ;;  %v1586_v10 = vor.u32 %v1983_v63, %v1583_v0  ;;  %v174_v49 = vld [vmem:[%s2274_s2] sm:$0x3] }
  0x69   :  { %1017 = vmatpush.bf16.msrb.mxu1 %v1690_v11  ;;  %986 = vmatmul.bf16.vlgmr.msra.gmra.mxu2 %v2147_v1  ;;  %v2003_v1 = vld [vmem:[#allocation2 + $0x2c4] sm:$0xf]  ;;  %v1650_v11 = vor.u32 %v1999_v2, %v1647_v4  ;;  %v2044_v47 = vld [vmem:[%s2275_s3 + $0x8] sm:$0xff]  ;;  %v2058_v2 = vld [vmem:[%s2275_s3 + $0x78] sm:$0xff] }
  0x6a   :  { %1030 = vmatpush.bf16.msrb.mxu2 %v1754_v12  ;;  %999 = vmatmul.bf16.vlgmr.msra.gmra.mxu3 %v2152_v6  ;;  %v1602_v6 = vor.u32 %v1987_v42, %v1599_v43  ;;  %v1666_v50 = vor.u32 %v2003_v1, %v1663_v46  ;;  %v1714_v12 = vor.u32 %v2015_v5, %v1711_v7  ;;  %v2050_v43 = vld [vmem:[%s2275_s3 + $0x38] sm:$0xff]  ;;  %v2049_v1 = vld [vmem:[%s2275_s3 + $0x30] sm:$0xff] }
  0x6b   :  { %1043 = vmatpush.bf16.msrb.mxu3 %v1818_v18  ;;  %v1778_v18 = vor.u32 %v2031_v8, %v1775_v9  ;;  %v1762_v42 = vor.u32 %v2027_v34, %v1759_v36  ;;  %v2057_v5 = vld [vmem:[%s2275_s3 + $0x70] sm:$0xff] }
  0x6c   :  { %1005 = vmatpush.bf16.msrb.mxu0 %v1618_v24  ;;  %v1578_v24 = vor.u32 %v1981_v13, %v1575_v16  ;;  %v2055_v13 = vld [vmem:[%s2275_s3 + $0x60] sm:$0xff]  ;;  %v2054_v16 = vld [vmem:[%s2275_s3 + $0x58] sm:$0xff] }
  0x6d   :  { %1018 = vmatpush.bf16.msrb.mxu1 %v1682_v25  ;;  %v1642_v25 = vor.u32 %v1997_v17, %v1639_v19  ;;  %v2053_v17 = vld [vmem:[%s2275_s3 + $0x50] sm:$0xff] }
  0x6e   :  { %1031 = vmatpush.bf16.msrb.mxu2 %v1746_v26  ;;  %v1706_v26 = vor.u32 %v2013_v20, %v1703_v21  ;;  %v2052_v20 = vld [vmem:[%s2275_s3 + $0x48] sm:$0xff] }
  0x6f   :  { %1044 = vmatpush.bf16.msrb.mxu3 %v1810_v30  ;;  %v1770_v30 = vor.u32 %v2029_v22, %v1767_v23 }
  0x70   :  { %1006 = vmatpush.bf16.msrb.mxu0 %v1610_v37  ;;  %v1570_v37 = vor.u32 %v1979_v27, %v1567_v28 }
  0x71   :  { %1019 = vmatpush.bf16.msrb.mxu1 %v1674_v38  ;;  %v1634_v38 = vor.u32 %v1995_v29, %v1631_v31 }
  0x72   :  { %1032 = vmatpush.bf16.msrb.mxu2 %v1738_v41  ;;  %v1698_v41 = vor.u32 %v2011_v32, %v1695_v33 }
  0x73   :  { %1045 = vmatpush.bf16.msrb.mxu3 %v1802_v45  ;;  %v2048_v45 = vld [vmem:[%s2275_s3 + $0x28] sm:$0xff] }
  0x74   :  { %1007 = vmatpush.bf16.msrb.mxu0 %v1602_v6  ;;  %v2043_v6 = vld [vmem:[%s2275_s3] sm:$0xff] }
  0x75   :  { %1020 = vmatpush.bf16.msrb.mxu1 %v1666_v50  ;;  %v176_v50 = vperm.slane %v174_v49, 0 }
  0x76   :  { %1033 = vmatpush.bf16.msrb.mxu2 %v1730_v15 }
  0x77   :  { %1046 = vmatpush.bf16.msrb.mxu3 %v1794_v54 }
  0x78   :  { %1008 = vmatpush.bf16.msrb.mxu0 %v1594_v60 }
  0x79   :  { %1021 = vmatpush.bf16.msrb.mxu1 %v1658_v61 }
  0x7a   :  { %1034 = vmatpush.bf16.msrb.mxu2 %v1722_v62 }
  0x7b   :  { %1047 = vmatpush.bf16.msrb.mxu3 %v1786_v3 }
  0x7c   :  { %1009 = vmatpush.bf16.msrb.mxu0 %v1586_v10  ;;  %v2056_v10 = vld [vmem:[%s2275_s3 + $0x68] sm:$0xff] }
  0x7d   :  { %1022 = vmatpush.bf16.msrb.mxu1 %v1650_v11 }
  0x7e   :  { %1035 = vmatpush.bf16.msrb.mxu2 %v1714_v12 }
  0x7f   :  { %1048 = vmatpush.bf16.msrb.mxu3 %v1778_v18 }
  0x80   :  { %1010 = vmatpush.bf16.msrb.mxu0 %v1578_v24  ;;  %v2051_v24 = vld [vmem:[%s2275_s3 + $0x40] sm:$0xff] }
  0x81   :  { %1023 = vmatpush.bf16.msrb.mxu1 %v1642_v25 }
  0x82   :  { %1036 = vmatpush.bf16.msrb.mxu2 %v1706_v26  ;;  %v177_v26 = vperm.slane %v174_v49, 1  ;;  %v2063_v49 = vld [vmem:[%s2277_s5 + $0x20] sm:$0xff] }
  0x83   :  { %1049 = vmatpush.bf16.msrb.mxu3 %v1770_v30 }
  0x84   :  { %1011 = vmatpush.bf16.msrb.mxu0 %v1570_v37 }
  0x85   :  { %1024 = vmatpush.bf16.msrb.mxu1 %v1634_v38 }
  0x86   :  { %1037 = vmatpush.bf16.msrb.mxu2 %v1698_v41 }
  0x87   :  { %1050 = vmatpush.bf16.msrb.mxu3 %v1762_v42  ;;  %1012 = vmatmul.bf16.vlgmr.msrb.gmra.mxu0 %v2170_v39  ;;  %v2047_v39 = vld [vmem:[%s2275_s3 + $0x20] sm:$0xff] }
  0x88   :  { %1192 = vmatpush.bf16.msra.mxu0 %v2050_v43  ;;  %1025 = vmatmul.bf16.vlgmr.msrb.gmra.mxu1 %v2174_v44 }
  0x89   :  { %1038 = vmatmul.bf16.vlgmr.msrb.gmra.mxu2 %v2168_v35  ;;  %v2046_v35 = vld [vmem:[%s2275_s3 + $0x18] sm:$0xff]  ;;  %1205 = vmatpush.bf16.msra.mxu1 %v2058_v2 }
  0x8a   :  { %1051 = vmatmul.bf16.vlgmr.msrb.gmra.mxu3 %v2172_v40  ;;  %v2045_v40 = vld [vmem:[%s2275_s3 + $0x10] sm:$0xff] }
  0x8c   :  { %1193 = vmatpush.bf16.msra.mxu0 %v2049_v1 }
  0x8d   :  { %1206 = vmatpush.bf16.msra.mxu1 %v2057_v5 }
  0x90   :  { %1194 = vmatpush.bf16.msra.mxu0 %v2048_v45 }
  0x91   :  { %1207 = vmatpush.bf16.msra.mxu1 %v2056_v10 }
  0x94   :  { %1195 = vmatpush.bf16.msra.mxu0 %v2047_v39 }
  0x95   :  { %1208 = vmatpush.bf16.msra.mxu1 %v2055_v13 }
  0x98   :  { %1196 = vmatpush.bf16.msra.mxu0 %v2046_v35 }
  0x99   :  { %1209 = vmatpush.bf16.msra.mxu1 %v2054_v16 }
  0x9c   :  { %1197 = vmatpush.bf16.msra.mxu0 %v2045_v40 }
  0x9d   :  { %1210 = vmatpush.bf16.msra.mxu1 %v2053_v17 }
  0xa0   :  { %1198 = vmatpush.bf16.msra.mxu0 %v2044_v47  ;;  %v2065_v47 = vld [vmem:[%s2277_s5 + $0x30] sm:$0xff] }
  0xa1   :  { %1211 = vmatpush.bf16.msra.mxu1 %v2052_v20 }
  0xa4   :  { %v857_v44 = vpop.f32.mrf.mxu0  ;;  %1199 = vmatpush.bf16.msra.mxu0 %v2043_v6  ;;  %v2061_v6 = vld [vmem:[%s2277_s5 + $0x10] sm:$0xff] }
  0xa5   :  { %v870_v46 = vpop.f32.mrf.mxu1  ;;  %v858_v52 = vadd.f32 %v857_v44, %v176_v50  ;;  %1212 = vmatpush.bf16.msra.mxu1 %v2051_v24 }
  0xa7   :  { %v871_v55 = vadd.f32 %v870_v46, %v858_v52  ;;  %v2066_v46 = vld [vmem:[%s2277_s5 + $0x38] sm:$0xff]  ;;  %v2059_v52 = vld [vmem:[%s2277_s5] sm:$0xff] }
  0xa8   :  { %1288 = vmatpush.bf16.msra.mxu2 %v2066_v46 }
  0xac   :  { %v883_v48 = vpop.f32.mrf.mxu2  ;;  %v859_v15 = vpop.f32.mrf.mxu0  ;;  %1289 = vmatpush.bf16.msra.mxu2 %v2065_v47 }
  0xad   :  { %v896_v14 = vpop.f32.mrf.mxu3  ;;  %v872_v51 = vpop.f32.mrf.mxu1  ;;  %v884_v56 = vadd.f32 %v883_v48, %v871_v55  ;;  %v2064_v48 = vld [vmem:[%s2277_s5 + $0x28] sm:$0xff] }
  0xae   :  { %v2060_v51 = vld [vmem:[%s2277_s5 + $0x8] sm:$0xff] }
  0xaf   :  { %v897_v57 = vadd.f32 %v896_v14, %v884_v56  ;;  %v2062_v14 = vld [vmem:[%s2277_s5 + $0x18] sm:$0xff] }
  0xb0   :  { %1290 = vmatpush.bf16.msra.mxu2 %v2064_v48 }
  0xb4   :  { %v885_v53 = vpop.f32.mrf.mxu2  ;;  %1291 = vmatpush.bf16.msra.mxu2 %v2063_v49 }
  0xb5   :  { %v898_v54 = vpop.f32.mrf.mxu3  ;;  %v2070_v53 = vld [vmem:[%s2276_s4] ss:$0 sm:$0xff] }
  0xb8   :  { %1292 = vmatpush.bf16.msra.mxu2 %v2062_v14 }
  0xbc   :  { %1293 = vmatpush.bf16.msra.mxu2 %v2061_v6 }
  0xc0   :  { %1294 = vmatpush.bf16.msra.mxu2 %v2060_v51 }
  0xc4   :  { %v909_v58 = vpop.f32.mrf.mxu0  ;;  %1295 = vmatpush.bf16.msra.mxu2 %v2059_v52 }
  0xc5   :  { %v910_v59 = vadd.f32 %v909_v58, %v897_v57  ;;  %v922_v60 = vpop.f32.mrf.mxu1 }
  0xc7   :  { %v923_v61 = vadd.f32 %v922_v60, %v910_v59  ;;  %v2071_v60 = vld [vmem:[%s2278_s6] ss:$0 sm:$0xff] }
  0xcc   :  { %v935_v62 = vpop.f32.mrf.mxu2  ;;  %v911_v4 = vpop.f32.mrf.mxu0 }
  0xcd   :  { %v936_v63 = vadd.f32 %v935_v62, %v923_v61  ;;  %v948_v0 = vpop.f32.mrf.mxu3  ;;  %v924_v7 = vpop.f32.mrf.mxu1 }
  0xcf   :  { %v949_v3 = vadd.f32 %v948_v0, %v936_v63 }
  0xd1   :  { %v1056_v8 = vmax.f32 %v949_v3, 0.0 }
  0xd3   :  { %v1058_v9 = vpack.c.bf16 %v1056_v8, %v1056_v8 }
  0xd4   :  { %v937_v11 = vpop.f32.mrf.mxu2 }
  0xd5   :  { %1200 = vmatmul.bf16.vlgmr.msra.gmra.mxu0 %v1058_v9  ;;  %v950_v12 = vpop.f32.mrf.mxu3 }
  0xe4   :  { %v961_v18 = vpop.f32.mrf.mxu0 }
  0xe5   :  { %v974_v19 = vpop.f32.mrf.mxu1  ;;  %v962_v29 = vadd.f32 %v961_v18, %v177_v26 }
  0xe7   :  { %v975_v30 = vadd.f32 %v974_v19, %v962_v29 }
  0xec   :  { %v987_v21 = vpop.f32.mrf.mxu2  ;;  %v963_v23 = vpop.f32.mrf.mxu0 }
  0xed   :  { %v1000_v22 = vpop.f32.mrf.mxu3  ;;  %v976_v25 = vpop.f32.mrf.mxu1  ;;  %v988_v31 = vadd.f32 %v987_v21, %v975_v30 }
  0xef   :  { %v1001_v32 = vadd.f32 %v1000_v22, %v988_v31 }
  0xf4   :  { %v989_v27 = vpop.f32.mrf.mxu2 }
  0xf5   :  { %v1002_v28 = vpop.f32.mrf.mxu3 }
 0x104   :  { %v1013_v33 = vpop.f32.mrf.mxu0 }
 0x105   :  { %v1026_v34 = vpop.f32.mrf.mxu1  ;;  %v1014_v36 = vadd.f32 %v1013_v33, %v1001_v32 }
 0x107   :  { %v1027_v37 = vadd.f32 %v1026_v34, %v1014_v36 }
 0x10c   :  { %v1039_v38 = vpop.f32.mrf.mxu2  ;;  %v1015_v43 = vpop.f32.mrf.mxu0 }
 0x10d   :  { %v1040_v41 = vadd.f32 %v1039_v38, %v1027_v37  ;;  %v1052_v42 = vpop.f32.mrf.mxu3  ;;  %v1028_v1 = vpop.f32.mrf.mxu1 }
 0x10f   :  { %v1053_v45 = vadd.f32 %v1052_v42, %v1040_v41 }
 0x111   :  { %v1057_v39 = vmax.f32 %v1053_v45, 0.0 }
 0x113   :  { %v1059_v35 = vpack.c.bf16 %v1057_v39, %v1057_v39 }
 0x114   :  { %v1041_v40 = vpop.f32.mrf.mxu2 }
 0x115   :  { %v1054_v44 = vpop.f32.mrf.mxu3  ;;  %1213 = vmatmul.bf16.vlgmr.msra.gmra.mxu1 %v1059_v35 }
 0x152   :  { %v1201_v50 = vpop.f32.mrf.mxu0 }
 0x153   :  { %v1202_v54 = vadd.f32 %v2070_v53, %v1201_v50 }
 0x15a   :  { %v1203_v15 = vpop.f32.mrf.mxu0 }
 0x192   :  { %v1214_v55 = vpop.f32.mrf.mxu1 }
 0x193   :  { %v1215_v56 = vadd.f32 %v1214_v55, %v1202_v54 }
 0x195   :  { %v1218_v57 = vmax.f32 %v1215_v56, 0.0 }
 0x197   :  { %v1219_v58 = vpack.c.bf16 %v1218_v57, %v1218_v57 }
 0x199   :  { %1296 = vmatmul.bf16.vlgmr.msra.gmra.mxu2 %v1219_v58 }
 0x19a   :  { %v1216_v59 = vpop.f32.mrf.mxu1 }
 0x21c   :  { %v1297_v61 = vpop.f32.mrf.mxu2 }
 0x21d   :  { %v1298_v62 = vadd.f32 %v2071_v60, %v1297_v61 }
 0x21f   :  { %1301 = vst [vmem:[%s2279_s7] sm:$0xff] %v1298_v62 }
 0x224   :  { %v1299_v63 = vpop.f32.mrf.mxu2 }
 0x225   :  { %1306 = vsyncpa [#allocation3], 1 }

</bundles_post_ra>
